<compile_context>
chip_gen: v7x
topology: tpu7x:2x2x1
jax: 0.10.0
libtpu: 0.0.40
codegen_flags: <defaults>
</compile_context>

<pallas_src>
import functools

import jax
import jax.numpy as jnp
from jax.experimental import pallas as pl
from jax.experimental.pallas import tpu as pltpu

LANE = 128
SUBLANE = 8


def _round_up(x, m):
    return ((x + m - 1) // m) * m


def _hardswish_nodiv(v):
    # Hardswish with the 1/6 factor folded into the *next* layer's weights:
    #   hardswish(v) @ W  ==  (v * relu6(v + 3)) @ (W / 6)
    return v * jnp.clip(v + 3.0, 0.0, 6.0)


def _tpu_vmem_limit_bytes():
    """Generation-aware VMEM ceiling (v7x: 64 MiB/TC, v5e/v6e: 128 MiB)."""
    phys = 64 << 20  # conservative default = smallest VMEM (v7x)
    try:
        phys = int(pltpu.get_tpu_info().vmem_capacity_bytes)
    except Exception:
        pass
    return min(int(phys * 0.8), 100 << 20)


def _num_tensorcores():
    """Best-effort count of TensorCores a 'parallel' grid axis shards over."""
    try:
        kind = jax.devices()[0].device_kind.lower()
    except Exception:
        return 1
    return 2 if any(t in kind for t in ("v4", "v5p", "v7")) else 1


def _epilogue_dtype():
    """bf16 bias/Hardswish epilogue on chips with a bf16 VPU (v6e/v7x), else f32."""
    try:
        kind = jax.devices()[0].device_kind.lower()
    except Exception:
        kind = ""
    return jnp.bfloat16 if ("v6" in kind or "v7" in kind) else jnp.float32


def _per_row_vmem_bytes(in_dim, h1, h2, n, x_itemsize, ep_itemsize):
    """VMEM bytes per batch row, including 128-lane padding and in-kernel temps."""
    r = lambda d: _round_up(d, LANE)
    bytes_row = 0
    bytes_row += 2 * r(in_dim) * x_itemsize        # x block, double-buffered
    bytes_row += 2 * r(n) * 4                      # f32 out block, double-buffered
    bytes_row += r(in_dim) * 2                     # bf16 copy of x fed to the MXU
    bytes_row += r(h1) * (4 + ep_itemsize + 2)     # f32 acc + epilogue act + bf16 MXU feed
    bytes_row += r(h2) * (4 + ep_itemsize + 2)
    bytes_row += r(n) * 4                          # final f32 result before store
    return bytes_row


def _choose_tile_b(B, per_row, fixed, budget, num_tc):
    """Biggest 64-aligned batch tile that fits the VMEM budget (cap 32K rows)."""
    avail = max(budget - fixed, SUBLANE * per_row)
    cap = min(avail // per_row, 32768)             # past ~32K rows/step no further gain
    tile = B if cap >= B else max(64, (cap // 64) * 64)
    # Multi-TC chips: give each core >=2 pipelined steps when the batch allows.
    if num_tc > 1 and B >= 4 * 64 * num_tc:
        per_core = max(64, (pl.cdiv(B, 2 * num_tc) // 64) * 64)
        tile = min(tile, per_core)
    return max(1, min(tile, B))


def _make_mlp_kernel(epilogue_dtype):
    def kernel(x_ref, w1_ref, b1_ref, w2_ref, b2_ref, w3_ref, b3_ref, o_ref):
        # In-kernel cast to bf16 (free on the VPU relative to DMA; keeps the HBM
        # read at the producer's dtype instead of an extra unfused convert pass).
        x = x_ref[...].astype(w1_ref.dtype)
        h = jnp.dot(x, w1_ref[...], preferred_element_type=jnp.float32)
        h = h.astype(epilogue_dtype) + b1_ref[...].astype(epilogue_dtype)
        h = _hardswish_nodiv(h)                                  # 1/6 folded into w2
        h = jnp.dot(h.astype(w2_ref.dtype), w2_ref[...],
                    preferred_element_type=jnp.float32)
        h = h.astype(epilogue_dtype) + b2_ref[...].astype(epilogue_dtype)
        h = _hardswish_nodiv(h)                                  # 1/6 folded into w3
        out = jnp.dot(h.astype(w3_ref.dtype), w3_ref[...],
                      preferred_element_type=jnp.float32)
        o_ref[...] = (out + b3_ref[...]).astype(o_ref.dtype)
    return kernel


@functools.partial(jax.jit, static_argnames=("tile_b",))
def embedding_forward(x, params, *, tile_b=None):
    """Fused MLP forward.  x: [B, in_dim] (any float dtype).  Returns f32 [B, n]."""
    w1, b1, w2, b2, w3, b3 = params
    B, in_dim = x.shape
    h1 = w1.shape[1]
    h2 = w2.shape[1]
    n = w3.shape[1]
    out_dtype = jnp.float32

    ep_dtype = _epilogue_dtype()
    num_tc = _num_tensorcores()
    vmem_limit = _tpu_vmem_limit_bytes()

    per_row = _per_row_vmem_bytes(in_dim, h1, h2, n,
                                  jnp.dtype(x.dtype).itemsize,
                                  jnp.dtype(ep_dtype).itemsize)
    # Resident weights/biases (double-buffered) + compiler scratch margin.
    fixed = 2 * sum(int(jnp.dtype(a.dtype).itemsize) * a.size for a in params)
    fixed += 2 << 20
    budget = int(vmem_limit * 0.7)

    if tile_b is None:
        tile_b = _choose_tile_b(B, per_row, fixed, budget, num_tc)
    else:
        tile_b = min(int(tile_b), B)
        if tile_b < B:  # a partial tile must keep the second-minor dim 8-aligned
            tile_b = max(SUBLANE, (tile_b // SUBLANE) * SUBLANE)

    # Ragged last block handled by Pallas: no wrapper pad, no output slice.
    grid = (pl.cdiv(B, tile_b),)

    in_specs = [
        # Batch-tiled input, default 2-deep auto-pipelining.
        pl.BlockSpec((tile_b, in_dim), lambda i: (i, 0)),
        # Weights / biases: constant block index -> resident across the grid.
        pl.BlockSpec((in_dim, h1), lambda i: (0, 0)),
        pl.BlockSpec((1, h1), lambda i: (0, 0)),
        pl.BlockSpec((h1, h2), lambda i: (0, 0)),
        pl.BlockSpec((1, h2), lambda i: (0, 0)),
        pl.BlockSpec((h2, n), lambda i: (0, 0)),
        pl.BlockSpec((1, n), lambda i: (0, 0)),
    ]
    out_spec = pl.BlockSpec((tile_b, n), lambda i: (i, 0))

    return pl.pallas_call(
        _make_mlp_kernel(ep_dtype),
        out_shape=jax.ShapeDtypeStruct((B, n), out_dtype),
        grid_spec=pltpu.PrefetchScalarGridSpec(
            num_scalar_prefetch=0,
            grid=grid,
            in_specs=in_specs,
            out_specs=out_spec,
        ),
        compiler_params=pltpu.CompilerParams(
            dimension_semantics=("parallel",),
            vmem_limit_bytes=vmem_limit),
    )(x, w1, b1, w2, b2, w3, b3)


def init_params(key, in_dim, n, sizes=(128, 64)):
    """Deterministic synthetic init matching nn.Linear shapes.

    Weights are stored transposed as [fan_in, fan_out] (MXU-native) in bf16,
    with the Hardswish 1/6 factor pre-folded into w2 and w3 (mathematically
    equivalent to the PyTorch Sequential).  Hidden biases are bf16 (added in
    the epilogue dtype); the final bias stays f32."""
    dims = [in_dim] + list(sizes) + [n]
    ws, bs = [], []
    for i in range(len(dims) - 1):
        fan_in, fan_out = dims[i], dims[i + 1]
        key, kw, kb = jax.random.split(key, 3)
        bound = 1.0 / float(fan_in) ** 0.5
        ws.append(jax.random.uniform(kw, (fan_in, fan_out), jnp.float32, -bound, bound))
        bs.append(jax.random.uniform(kb, (1, fan_out), jnp.float32, -bound, bound))
    w1, w2, w3 = ws
    b1, b2, b3 = bs
    w2 = w2 * (1.0 / 6.0)   # fold Hardswish scale of layer-1 activation
    w3 = w3 * (1.0 / 6.0)   # fold Hardswish scale of layer-2 activation
    return (w1.astype(jnp.bfloat16), b1.astype(jnp.bfloat16),
            w2.astype(jnp.bfloat16), b2.astype(jnp.bfloat16),
            w3.astype(jnp.bfloat16), b3.astype(jnp.float32))


def _reference_forward(x, params, epilogue_dtype):
    """Pure-JAX mirror of the kernel's math/dtype choices (folded 1/6, bf16 MXU
    inputs, f32 accumulation, epilogue-dtype bias-add + Hardswish)."""
    w1, b1, w2, b2, w3, b3 = params
    h = jnp.dot(x.astype(w1.dtype), w1, preferred_element_type=jnp.float32)
    h = _hardswish_nodiv(h.astype(epilogue_dtype) + b1.astype(epilogue_dtype))
    h = jnp.dot(h.astype(w2.dtype), w2, preferred_element_type=jnp.float32)
    h = _hardswish_nodiv(h.astype(epilogue_dtype) + b2.astype(epilogue_dtype))
    out = jnp.dot(h.astype(w3.dtype), w3, preferred_element_type=jnp.float32)
    return out + b3


if __name__ == "__main__":
    key = jax.random.PRNGKey(0)
    # Small shapes consistent with the module: B=200 is not a multiple of common
    # tiles, so the explicit tile_b=64 run exercises the ragged-last-block path.
    B, in_dim, n = 200, 32, 16

    key, kx, kp = jax.random.split(key, 3)
    x = jax.random.normal(kx, (B, in_dim), jnp.float32)
    params = init_params(kp, in_dim, n)

    ep = _epilogue_dtype()
    ref = _reference_forward(x, params, ep)

    # Default (auto-tiled) path: whole batch in one step at this tiny size.
    out = jax.block_until_ready(embedding_forward(x, params))
    assert out.shape == (B, n), out.shape
    assert out.dtype == jnp.float32, out.dtype
    assert jnp.allclose(out, ref, atol=2e-2, rtol=2e-2), "mismatch (auto tile)"

    # Forced small tile: grid = 4 with a ragged last block (8 valid of 64 rows),
    # verifying Pallas drops the out-of-range rows on writeback.
    out_tiled = jax.block_until_ready(embedding_forward(x, params, tile_b=64))
    assert out_tiled.shape == (B, n), out_tiled.shape
    assert jnp.allclose(out_tiled, ref, atol=2e-2, rtol=2e-2), "mismatch (tiled)"

    print("KERNEL_OK")
</pallas_src>

<mosaic_0001>
module attributes {stable_mosaic.version = 11 : i64} {
  func.func @kernel(%arg0: i32, %arg1: memref<200x32xf32, #tpu.memory_space<vmem>>, %arg2: memref<32x128xbf16, #tpu.memory_space<vmem>>, %arg3: memref<1x128xbf16, #tpu.memory_space<vmem>>, %arg4: memref<128x64xbf16, #tpu.memory_space<vmem>>, %arg5: memref<1x64xbf16, #tpu.memory_space<vmem>>, %arg6: memref<64x16xbf16, #tpu.memory_space<vmem>>, %arg7: memref<1x16xf32, #tpu.memory_space<vmem>>, %arg8: memref<200x16xf32, #tpu.memory_space<vmem>>) attributes {dimension_semantics = [#tpu.dimension_semantics<parallel>], iteration_bounds = array<i64: 1>, scalar_prefetch = 0 : i64, scratch_operands = 0 : i64, tpu.core_type = #tpu.core_type<tc>, window_params = [{transform_indices = @transform_0, window_bounds = array<i64: 200, 32>}, {pipeline_mode = #tpu.pipeline_mode<synchronous>, transform_indices = @transform_1, window_bounds = array<i64: 32, 128>}, {pipeline_mode = #tpu.pipeline_mode<synchronous>, transform_indices = @transform_2, window_bounds = array<i64: 1, 128>}, {pipeline_mode = #tpu.pipeline_mode<synchronous>, transform_indices = @transform_3, window_bounds = array<i64: 128, 64>}, {pipeline_mode = #tpu.pipeline_mode<synchronous>, transform_indices = @transform_4, window_bounds = array<i64: 1, 64>}, {pipeline_mode = #tpu.pipeline_mode<synchronous>, transform_indices = @transform_5, window_bounds = array<i64: 64, 16>}, {pipeline_mode = #tpu.pipeline_mode<synchronous>, transform_indices = @transform_6, window_bounds = array<i64: 1, 16>}, {transform_indices = @transform_7, window_bounds = array<i64: 200, 16>}]} {
    %c0 = arith.constant 0 : index
    %c0_0 = arith.constant 0 : index
    %0 = vector.load %arg1[%c0, %c0_0] : memref<200x32xf32, #tpu.memory_space<vmem>>, vector<200x32xf32>
    %1 = arith.truncf %0 : vector<200x32xf32> to vector<200x32xbf16>
    %c0_1 = arith.constant 0 : index
    %c0_2 = arith.constant 0 : index
    %2 = vector.load %arg2[%c0_1, %c0_2] : memref<32x128xbf16, #tpu.memory_space<vmem>>, vector<32x128xbf16>
    %cst = arith.constant dense<0.000000e+00> : vector<200x128xf32>
    %3 = tpu.matmul %1, %2, %cst {dimension_numbers = #tpu.dot_dimension_numbers<[1], [0], [0], [1], [0, 0, 1, 1], [], []>} : vector<200x32xbf16>, vector<32x128xbf16>, vector<200x128xf32> -> vector<200x128xf32>
    %c0_3 = arith.constant 0 : index
    %c0_4 = arith.constant 0 : index
    %4 = vector.load %arg3[%c0_3, %c0_4] : memref<1x128xbf16, #tpu.memory_space<vmem>>, vector<1x128xbf16>
    %5 = arith.extf %4 : vector<1x128xbf16> to vector<1x128xf32>
    %6 = vector.broadcast %5 : vector<1x128xf32> to vector<200x128xf32>
    %7 = arith.addf %3, %6 : vector<200x128xf32>
    %cst_5 = arith.constant 3.000000e+00 : f32
    %8 = vector.broadcast %cst_5 : f32 to vector<200x128xf32>
    %9 = arith.addf %7, %8 : vector<200x128xf32>
    %cst_6 = arith.constant 0.000000e+00 : f32
    %cst_7 = arith.constant 6.000000e+00 : f32
    %10 = vector.broadcast %cst_6 : f32 to vector<200x128xf32>
    %11 = arith.maximumf %10, %9 : vector<200x128xf32>
    %12 = vector.broadcast %cst_7 : f32 to vector<200x128xf32>
    %13 = arith.minimumf %12, %11 : vector<200x128xf32>
    %14 = arith.mulf %7, %13 : vector<200x128xf32>
    %15 = arith.truncf %14 : vector<200x128xf32> to vector<200x128xbf16>
    %c0_8 = arith.constant 0 : index
    %c0_9 = arith.constant 0 : index
    %16 = vector.load %arg4[%c0_8, %c0_9] : memref<128x64xbf16, #tpu.memory_space<vmem>>, vector<128x64xbf16>
    %cst_10 = arith.constant dense<0.000000e+00> : vector<200x64xf32>
    %17 = tpu.matmul %15, %16, %cst_10 {dimension_numbers = #tpu.dot_dimension_numbers<[1], [0], [0], [1], [0, 0, 1, 1], [], []>} : vector<200x128xbf16>, vector<128x64xbf16>, vector<200x64xf32> -> vector<200x64xf32>
    %c0_11 = arith.constant 0 : index
    %c0_12 = arith.constant 0 : index
    %18 = vector.load %arg5[%c0_11, %c0_12] : memref<1x64xbf16, #tpu.memory_space<vmem>>, vector<1x64xbf16>
    %19 = arith.extf %18 : vector<1x64xbf16> to vector<1x64xf32>
    %20 = vector.broadcast %19 : vector<1x64xf32> to vector<200x64xf32>
    %21 = arith.addf %17, %20 : vector<200x64xf32>
    %cst_13 = arith.constant 3.000000e+00 : f32
    %22 = vector.broadcast %cst_13 : f32 to vector<200x64xf32>
    %23 = arith.addf %21, %22 : vector<200x64xf32>
    %cst_14 = arith.constant 0.000000e+00 : f32
    %cst_15 = arith.constant 6.000000e+00 : f32
    %24 = vector.broadcast %cst_14 : f32 to vector<200x64xf32>
    %25 = arith.maximumf %24, %23 : vector<200x64xf32>
    %26 = vector.broadcast %cst_15 : f32 to vector<200x64xf32>
    %27 = arith.minimumf %26, %25 : vector<200x64xf32>
    %28 = arith.mulf %21, %27 : vector<200x64xf32>
    %29 = arith.truncf %28 : vector<200x64xf32> to vector<200x64xbf16>
    %c0_16 = arith.constant 0 : index
    %c0_17 = arith.constant 0 : index
    %30 = vector.load %arg6[%c0_16, %c0_17] : memref<64x16xbf16, #tpu.memory_space<vmem>>, vector<64x16xbf16>
    %cst_18 = arith.constant dense<0.000000e+00> : vector<200x16xf32>
    %31 = tpu.matmul %29, %30, %cst_18 {dimension_numbers = #tpu.dot_dimension_numbers<[1], [0], [0], [1], [0, 0, 1, 1], [], []>} : vector<200x64xbf16>, vector<64x16xbf16>, vector<200x16xf32> -> vector<200x16xf32>
    %c0_19 = arith.constant 0 : index
    %c0_20 = arith.constant 0 : index
    %32 = vector.load %arg7[%c0_19, %c0_20] : memref<1x16xf32, #tpu.memory_space<vmem>>, vector<1x16xf32>
    %33 = vector.broadcast %32 : vector<1x16xf32> to vector<200x16xf32>
    %34 = arith.addf %31, %33 : vector<200x16xf32>
    %c0_21 = arith.constant 0 : index
    %c0_22 = arith.constant 0 : index
    %35 = vector.load %arg8[%c0_21, %c0_22] : memref<200x16xf32, #tpu.memory_space<vmem>>, vector<200x16xf32>
    tpu.vector_store %arg8[%c0_21, %c0_22], %34 {strides = array<i32>} : memref<200x16xf32, #tpu.memory_space<vmem>>, vector<200x16xf32>,
    return
  }
  func.func @transform_0(%arg0: i32) -> (i32, i32) {
    %c0_i32 = arith.constant 0 : i32
    %c0_i32_0 = arith.constant 0 : i32
    return %arg0, %c0_i32 : i32, i32
  }
  func.func @transform_1(%arg0: i32) -> (i32, i32) {
    %c0_i32 = arith.constant 0 : i32
    %c0_i32_0 = arith.constant 0 : i32
    %c0_i32_1 = arith.constant 0 : i32
    return %c0_i32, %c0_i32_0 : i32, i32
  }
  func.func @transform_2(%arg0: i32) -> (i32, i32) {
    %c0_i32 = arith.constant 0 : i32
    %c0_i32_0 = arith.constant 0 : i32
    %c0_i32_1 = arith.constant 0 : i32
    return %c0_i32, %c0_i32_0 : i32, i32
  }
  func.func @transform_3(%arg0: i32) -> (i32, i32) {
    %c0_i32 = arith.constant 0 : i32
    %c0_i32_0 = arith.constant 0 : i32
    %c0_i32_1 = arith.constant 0 : i32
    return %c0_i32, %c0_i32_0 : i32, i32
  }
  func.func @transform_4(%arg0: i32) -> (i32, i32) {
    %c0_i32 = arith.constant 0 : i32
    %c0_i32_0 = arith.constant 0 : i32
    %c0_i32_1 = arith.constant 0 : i32
    return %c0_i32, %c0_i32_0 : i32, i32
  }
  func.func @transform_5(%arg0: i32) -> (i32, i32) {
    %c0_i32 = arith.constant 0 : i32
    %c0_i32_0 = arith.constant 0 : i32
    %c0_i32_1 = arith.constant 0 : i32
    return %c0_i32, %c0_i32_0 : i32, i32
  }
  func.func @transform_6(%arg0: i32) -> (i32, i32) {
    %c0_i32 = arith.constant 0 : i32
    %c0_i32_0 = arith.constant 0 : i32
    %c0_i32_1 = arith.constant 0 : i32
    return %c0_i32, %c0_i32_0 : i32, i32
  }
  func.func @transform_7(%arg0: i32) -> (i32, i32) {
    %c0_i32 = arith.constant 0 : i32
    %c0_i32_0 = arith.constant 0 : i32
    return %arg0, %c0_i32 : i32, i32
  }
}

</mosaic_0001>

<bundles_post_ra>
// kernel: embedding_forward.1
= control target key start
LH: loop header
LB: loop body
LE: loop exit
PB: predicated region body
PF: predicated region fallthrough
CT: control target
= control target key end

     0   :  { %v1238_v0 = vmov 0.0   ;;  %vm1239_vm0 = vmmov 0   ;;  %vm87_vm1 = vcmask 261120   ;;  %v71_v50 = vlaneseq  ;;  %s1747_s1 = inlined_call_operand.vmem [shape: bf16[32,128], index: 1, kind: input, shape index: {}]   ;;  %s1748_s0 = inlined_call_operand.vmem [shape: f32[200,32], index: 0, kind: input, shape index: {}]   ;;  %s1749_s3 = inlined_call_operand.vmem [shape: bf16[128,64], index: 3, kind: input, shape index: {}]   ;;  %s1750_s5 = inlined_call_operand.vmem [shape: bf16[64,16], index: 5, kind: input, shape index: {}]   ;;  %s1751_s2 = inlined_call_operand.vmem [shape: bf16[1,128], index: 2, kind: input, shape index: {}]   ;;  %s1752_s4 = inlined_call_operand.vmem [shape: bf16[1,64], index: 4, kind: input, shape index: {}]   ;;  %s1753_s6 = inlined_call_operand.vmem [shape: f32[1,16], index: 6, kind: input, shape index: {}]   ;;  %s1754_s7 = inlined_call_operand.vmem [shape: f32[200,16], index: 7, kind: output, shape index: {}]  }
   0x1   :  { %1034 = vmatprep.subr.bf16.mxu0 %v1238_v0  ;;  %v1224_v1 = vld [vmem:[%s1747_s1] sm:$0xff]   ;;  %1038 = vmatprep.mubr.msk.bf16.mxu0 %vm1239_vm0, %v1238_v0  ;;  %v1225_v2 = vld [vmem:[%s1747_s1 + $0x8] sm:$0xff]   ;;  %v41_v6 = vld [vmem:[%s1748_s0 + $0x70] sm:$0xff]  ;;  %vm734_vm2 = vcmask 523264   ;;  %vm910_vm3 = vcmask 130048  }
   0x2   :  { %1218 = vmatprep.subr.bf16.mxu1 %v1238_v0  ;;  %1066 = vmatprep.mubr.msk.bf16.mxu1 %vm1239_vm0, %v1238_v0  ;;  %v27_v3 = vld [vmem:[%s1748_s0] sm:$0xff]  ;;  %v28_v4 = vld [vmem:[%s1748_s0 + $0x8] sm:$0xff]  ;;  %v42_v7 = vld [vmem:[%s1748_s0 + $0x78] sm:$0xff]  ;;  %v1448_v52 = vshrl.u32 %v71_v50, 7 }
   0x3   :  { %1035 = vmatpush3.bf16.msra.mxu0 %v1224_v1  ;;  %1220 = vmatpush3.bf16.msra.mxu1 %v1224_v1  ;;  %v52_v5 = vpack.c.bf16 %v28_v4, %v27_v3  ;;  %v59_v8 = vpack.c.bf16 %v42_v7, %v41_v6  ;;  %v29_v9 = vld [vmem:[%s1748_s0 + $0x10] sm:$0xff]  ;;  %v30_v10 = vld [vmem:[%s1748_s0 + $0x18] sm:$0xff]  ;;  %v43_v11 = vld [vmem:[%s1748_s0 + $0x80] sm:$0xff] }
   0x4   :  { %1036 = vmatprep.subr.bf16.mxu0 %v1238_v0  ;;  %1219 = vmatprep.subr.bf16.mxu1 %v1238_v0  ;;  %v44_v12 = vld [vmem:[%s1748_s0 + $0x88] sm:$0xff]  ;;  %v1226_v13 = vld [vmem:[%s1749_s3] sm:$0xff]   ;;  %v53_v14 = vpack.c.bf16 %v30_v10, %v29_v9  ;;  %v1228_v17 = vld [vmem:[%s1749_s3 + $0x10] sm:$0xff]   ;;  %v73_v56 = vsub.s32 0, %v1448_v52 }
   0x5   :  { %v1227_v15 = vld [vmem:[%s1749_s3 + $0x8] sm:$0xff]   ;;  %v60_v16 = vpack.c.bf16 %v44_v12, %v43_v11  ;;  %v31_v18 = vld [vmem:[%s1748_s0 + $0x20] sm:$0xff]  ;;  %v45_v20 = vld [vmem:[%s1748_s0 + $0x90] sm:$0xff] }
   0x6   :  { %v32_v19 = vld [vmem:[%s1748_s0 + $0x28] sm:$0xff]  ;;  %v46_v21 = vld [vmem:[%s1748_s0 + $0x98] sm:$0xff]  ;;  %v1230_v25 = vld [vmem:[%s1749_s3 + $0x20] sm:$0xff]  }
   0x7   :  { %1037 = vmatpush3.bf16.msra.mxu0 %v1225_v2  ;;  %1221 = vmatpush3.bf16.msra.mxu1 %v1225_v2  ;;  %v54_v22 = vpack.c.bf16 %v32_v19, %v31_v18  ;;  %v1229_v23 = vld [vmem:[%s1749_s3 + $0x18] sm:$0xff]   ;;  %v61_v24 = vpack.c.bf16 %v46_v21, %v45_v20  ;;  %v33_v26 = vld [vmem:[%s1748_s0 + $0x30] sm:$0xff]  ;;  %v47_v28 = vld [vmem:[%s1748_s0 + $0xa0] sm:$0xff] }
   0x8   :  { %1090 = vmatprep.subr.bf16.mxu1 %v1238_v0  ;;  %1158 = vmatprep.subr.bf16.mxu0 %v1238_v0  ;;  %v34_v27 = vld [vmem:[%s1748_s0 + $0x38] sm:$0xff]  ;;  %v48_v29 = vld [vmem:[%s1748_s0 + $0xa8] sm:$0xff]  ;;  %v35_v33 = vld [vmem:[%s1748_s0 + $0x40] sm:$0xff] }
   0x9   :  { %v55_v30 = vpack.c.bf16 %v34_v27, %v33_v26  ;;  %v1231_v31 = vld [vmem:[%s1749_s3 + $0x28] sm:$0xff]   ;;  %v62_v32 = vpack.c.bf16 %v48_v29, %v47_v28  ;;  %v49_v35 = vld [vmem:[%s1748_s0 + $0xb0] sm:$0xff]  ;;  %v50_v36 = vld [vmem:[%s1748_s0 + $0xb8] sm:$0xff] }
   0xa   :  { %1039 = vmatmul.mubr.msk.bf16.vlgmr.msra.gmra.mrb[0].mxu0 %vm87_vm1, %v52_v5  ;;  %1067 = vmatmul.mubr.msk.bf16.vlgmr.msra.gmra.mrb[0].mxu1 %vm87_vm1, %v59_v8  ;;  %v36_v34 = vld [vmem:[%s1748_s0 + $0x48] sm:$0xff]  ;;  %v63_v38 = vpack.c.bf16 %v50_v36, %v49_v35  ;;  %v37_v39 = vld [vmem:[%s1748_s0 + $0x50] sm:$0xff]  ;;  %v38_v40 = vld [vmem:[%s1748_s0 + $0x58] sm:$0xff] }
   0xb   :  { %1042 = vmatprep.mubr.msk.bf16.mxu0 %vm1239_vm0, %v1238_v0  ;;  %1070 = vmatprep.mubr.msk.bf16.mxu1 %vm1239_vm0, %v1238_v0  ;;  %v56_v37 = vpack.c.bf16 %v36_v34, %v35_v33  ;;  %v51_v41 = vld [vmem:[%s1748_s0 + $0xc0] sm:$0xff]  ;;  %v57_v42 = vpack.c.bf16 %v38_v40, %v37_v39  ;;  %v40_v45 = vld [vmem:[%s1748_s0 + $0x68] sm:$0xff]  ;;  %v1232_v47 = vld [vmem:[%s1749_s3 + $0x30] sm:$0xff]  }
   0xc   :  { %1091 = vmatpush3.bf16.msra.mxu1 %v1226_v13  ;;  %v64_v43 = vpack.c.bf16 %v51_v41, %v51_v41  ;;  %v39_v44 = vld [vmem:[%s1748_s0 + $0x60] sm:$0xff]  ;;  %v1233_v48 = vld [vmem:[%s1749_s3 + $0x38] sm:$0xff]   ;;  %v1235_v51 = vld [vmem:[%s1750_s5 + $0x8] sm:$0xff]  }
   0xd   :  { %1092 = vmatprep.subr.bf16.mxu1 %v1238_v0  ;;  %v58_v46 = vpack.c.bf16 %v40_v45, %v39_v44  ;;  %v1234_v49 = vld [vmem:[%s1750_s5] sm:$0xff]   ;;  %v1236_v54 = vld [vmem:[%s1750_s5 + $0x10] sm:$0xff]  }
   0xe   :  { %1159 = vmatpush3.bf16.msra.mxu0 %v1234_v49  ;;  %v69_v53 = vld [vmem:[%s1751_s2] sm:$0x1] }
   0xf   :  { %1160 = vmatprep.subr.bf16.mxu0 %v1238_v0  ;;  %v70_v55 = vunpack.c.l.bf16 %v69_v53 }
  0x10   :  { %1093 = vmatpush3.bf16.msra.mxu1 %v1227_v15 }
  0x11   :  { %1094 = vmatprep.subr.bf16.mxu1 %v1238_v0  ;;  %v1461_v57 = vrot.slane %v70_v55, %v73_v56 }
  0x12   :  { %1043 = vmatmul.mubr.msk.bf16.gmra.mrb[4].mxu0 %vm87_vm1, %v53_v14  ;;  %1071 = vmatmul.mubr.msk.bf16.gmra.mrb[4].mxu1 %vm87_vm1, %v60_v16 }
  0x13   :  { %1046 = vmatprep.mubr.msk.bf16.mxu0 %vm1239_vm0, %v1238_v0  ;;  %1074 = vmatprep.mubr.msk.bf16.mxu1 %vm1239_vm0, %v1238_v0 }
  0x14   :  { %1095 = vmatpush3.bf16.msra.mxu1 %v1228_v17  ;;  %1161 = vmatpush3.bf16.msra.mxu0 %v1235_v51 }
  0x15   :  { %1096 = vmatprep.subr.bf16.mxu1 %v1238_v0  ;;  %1162 = vmatprep.subr.bf16.mxu0 %v1238_v0 }
  0x18   :  { %1097 = vmatpush3.bf16.msra.mxu1 %v1229_v23  ;;  %1163 = vmatpush3.bf16.msra.mxu0 %v1236_v54 }
  0x19   :  { %1098 = vmatprep.subr.bf16.mxu1 %v1238_v0  ;;  %1164 = vmatprep.subr.bf16.mxu0 %v1238_v0 }
  0x1a   :  { %1047 = vmatmul.mubr.msk.bf16.gmra.mrb[8].mxu0 %vm87_vm1, %v54_v22  ;;  %1075 = vmatmul.mubr.msk.bf16.gmra.mrb[8].mxu1 %vm87_vm1, %v61_v24 }
  0x1b   :  { %1050 = vmatprep.mubr.msk.bf16.mxu0 %vm1239_vm0, %v1238_v0  ;;  %1078 = vmatprep.mubr.msk.bf16.mxu1 %vm1239_vm0, %v1238_v0 }
  0x1c   :  { %1099 = vmatpush3.bf16.msra.mxu1 %v1230_v25 }
  0x1d   :  { %1100 = vmatprep.subr.bf16.mxu1 %v1238_v0 }
  0x20   :  { %1101 = vmatpush3.bf16.msra.mxu1 %v1231_v31 }
  0x21   :  { %1102 = vmatprep.subr.bf16.mxu1 %v1238_v0 }
  0x22   :  { %1051 = vmatmul.mubr.msk.bf16.gmra.mrb[12].mxu0 %vm87_vm1, %v55_v30  ;;  %1079 = vmatmul.mubr.msk.bf16.gmra.mrb[12].mxu1 %vm87_vm1, %v62_v32 }
  0x23   :  { %1054 = vmatprep.mubr.msk.bf16.mxu0 %vm1239_vm0, %v1238_v0  ;;  %1082 = vmatprep.mubr.msk.bf16.mxu1 %vm1239_vm0, %v1238_v0 }
  0x24   :  { %1103 = vmatpush3.bf16.msra.mxu1 %v1232_v47 }
  0x25   :  { %1104 = vmatprep.subr.bf16.mxu1 %v1238_v0 }
  0x28   :  { %1105 = vmatpush3.bf16.msra.mxu1 %v1233_v48 }
  0x2a   :  { %1055 = vmatmul.mubr.msk.bf16.gmra.mrb[16].mxu0 %vm87_vm1, %v56_v37  ;;  %1083 = vmatmul.mubr.msk.bf16.gmra.mrb[16].mxu1 %vm87_vm1, %v63_v38 }
  0x2b   :  { %1058 = vmatprep.mubr.msk.bf16.mxu0 %vm1239_vm0, %v1238_v0  ;;  %1086 = vmatprep.mubr.msk.bf16.mxu1 %vm1239_vm0, %v1238_v0 }
  0x32   :  { %1059 = vmatmul.mubr.msk.bf16.gmra.mrb[20].mxu0 %vm87_vm1, %v57_v42  ;;  %1087 = vmatmul.mubr.msk.bf16.gmra.mrb[20].mxu1 %vm87_vm1, %v64_v43 }
  0x33   :  { %1062 = vmatprep.mubr.msk.bf16.mxu0 %vm1239_vm0, %v1238_v0  ;;  %1106 = vmatprep.mubr.msk.bf16.mxu1 %vm1239_vm0, %v1238_v0 }
  0x3a   :  { %1063 = vmatmul.mubr.msk.bf16.gmra.mrb[24].mxu0 %vm87_vm1, %v58_v46 }
  0x3b   :  { %1166 = vmatprep.mubr.msk.bf16.mxu0 %vm1239_vm0, %v1238_v0 }
  0xdd   :  { %v161_v58 = vpop.f32.mrb[0].mxu0  ;;  %v217_v61 = vpop.f32.mrb[0].mxu1 }
  0xde   :  { %v162_v59 = vadd.f32 %v161_v58, %v1461_v57  ;;  %v1040_v60 = vpop.f32.mrb[1].mxu0  ;;  %v218_v63 = vadd.f32 %v217_v61, %v1461_v57  ;;  %v1068_v1 = vpop.f32.mrb[1].mxu1 }
  0xdf   :  { %v164_v62 = vpop.f32.mrb[2].mxu0  ;;  %v220_v5 = vpop.f32.mrb[2].mxu1 }
  0xe0   :  { %v263_v2 = vadd.f32 3.0, %v162_v59  ;;  %v165_v3 = vadd.f32 %v164_v62, %v1461_v57  ;;  %v1041_v4 = vpop.f32.mrb[3].mxu0  ;;  %v277_v6 = vadd.f32 3.0, %v218_v63  ;;  %v221_v7 = vadd.f32 %v220_v5, %v1461_v57  ;;  %v1069_v8 = vpop.f32.mrb[3].mxu1 }
  0xe2   :  { %v288_v9 = vmax.f32 %v263_v2, 0.0  ;;  %v264_v10 = vadd.f32 3.0, %v165_v3  ;;  %v302_v11 = vmax.f32 %v277_v6, 0.0  ;;  %v278_v12 = vadd.f32 3.0, %v221_v7 }
  0xe4   :  { %v313_v13 = vmin.f32 %v288_v9, 6.0  ;;  %v289_v14 = vmax.f32 %v264_v10, 0.0  ;;  %v327_v16 = vmin.f32 %v302_v11, 6.0  ;;  %v303_v17 = vmax.f32 %v278_v12, 0.0 }
  0xe5   :  { %v169_v15 = vpop.f32.mrb[4].mxu0  ;;  %v225_v21 = vpop.f32.mrb[4].mxu1 }
  0xe6   :  { %v314_v18 = vmin.f32 %v289_v14, 6.0  ;;  %v170_v19 = vadd.f32 %v169_v15, %v1461_v57  ;;  %v1044_v20 = vpop.f32.mrb[5].mxu0  ;;  %v1468_v23 = vmul.f32 %v327_v16, %v218_v63  ;;  %v328_v24 = vmin.f32 %v303_v17, 6.0  ;;  %v1072_v26 = vpop.f32.mrb[5].mxu1 }
  0xe7   :  { %v172_v22 = vpop.f32.mrb[6].mxu0  ;;  %v226_v25 = vadd.f32 %v225_v21, %v1461_v57  ;;  %v338_v27 = vmul.f32 %v313_v13, %v162_v59  ;;  %v228_v32 = vpop.f32.mrb[6].mxu1 }
  0xe8   :  { %v339_v28 = vmul.f32 %v314_v18, %v165_v3  ;;  %v265_v29 = vadd.f32 3.0, %v170_v19  ;;  %v173_v30 = vadd.f32 %v172_v22, %v1461_v57  ;;  %v1045_v31 = vpop.f32.mrb[7].mxu0  ;;  %v1472_v33 = vmul.f32 %v328_v24, %v221_v7  ;;  %v1073_v36 = vpop.f32.mrb[7].mxu1 }
  0xe9   :  { %v279_v34 = vadd.f32 3.0, %v226_v25  ;;  %v229_v35 = vadd.f32 %v228_v32, %v1461_v57 }
  0xea   :  { %v363_v37 = vpack.c.bf16 %v339_v28, %v338_v27  ;;  %v290_v38 = vmax.f32 %v265_v29, 0.0  ;;  %v266_v39 = vadd.f32 3.0, %v173_v30  ;;  %v370_v42 = vpack.c.bf16 %v1472_v33, %v1468_v23 }
  0xeb   :  { %v304_v40 = vmax.f32 %v279_v34, 0.0  ;;  %v280_v41 = vadd.f32 3.0, %v229_v35 }
  0xec   :  { %v315_v43 = vmin.f32 %v290_v38, 6.0  ;;  %v291_v44 = vmax.f32 %v266_v39, 0.0  ;;  %1107 = vmatmul.mubr.bf16.vlgmr.msra.gmra.mrb[24].mxu1 %v363_v37 }
  0xed   :  { %v177_v45 = vpop.f32.mrb[8].mxu0  ;;  %1110 = vmatprep.mubr.msk.bf16.mxu1 %vm1239_vm0, %v1238_v0  ;;  %v329_v46 = vmin.f32 %v304_v40, 6.0  ;;  %v305_v47 = vmax.f32 %v280_v41, 0.0  ;;  %v233_v51 = vpop.f32.mrb[8].mxu1 }
  0xee   :  { %v316_v48 = vmin.f32 %v291_v44, 6.0  ;;  %v178_v49 = vadd.f32 %v177_v45, %v1461_v57  ;;  %v1048_v50 = vpop.f32.mrb[9].mxu0  ;;  %v234_v58 = vadd.f32 %v233_v51, %v1461_v57  ;;  %v1076_v59 = vpop.f32.mrb[9].mxu1  ;;  %v340_v60 = vmul.f32 %v315_v43, %v170_v19 }
  0xef   :  { %v180_v53 = vpop.f32.mrb[10].mxu0  ;;  %v1480_v54 = vmul.f32 %v329_v46, %v226_v25  ;;  %v330_v55 = vmin.f32 %v305_v47, 6.0  ;;  %v236_v2 = vpop.f32.mrb[10].mxu1 }
  0xf0   :  { %v341_v61 = vmul.f32 %v316_v48, %v173_v30  ;;  %v267_v62 = vadd.f32 3.0, %v178_v49  ;;  %v181_v63 = vadd.f32 %v180_v53, %v1461_v57  ;;  %v1049_v1 = vpop.f32.mrb[11].mxu0  ;;  %v281_v4 = vadd.f32 3.0, %v234_v58  ;;  %v1077_v6 = vpop.f32.mrb[11].mxu1 }
  0xf1   :  { %v1484_v3 = vmul.f32 %v330_v55, %v229_v35  ;;  %v237_v5 = vadd.f32 %v236_v2, %v1461_v57 }
  0xf2   :  { %v292_v7 = vmax.f32 %v267_v62, 0.0  ;;  %v268_v8 = vadd.f32 3.0, %v181_v63  ;;  %v364_v9 = vpack.c.bf16 %v341_v61, %v340_v60  ;;  %v306_v10 = vmax.f32 %v281_v4, 0.0 }
  0xf3   :  { %v282_v11 = vadd.f32 3.0, %v237_v5  ;;  %v371_v12 = vpack.c.bf16 %v1484_v3, %v1480_v54  ;;  %v1237_v54 = vld [vmem:[%s1750_s5 + $0x18] sm:$0xff]  }
  0xf4   :  { %v317_v13 = vmin.f32 %v292_v7, 6.0  ;;  %v293_v14 = vmax.f32 %v268_v8, 0.0  ;;  %1111 = vmatmul.mubr.bf16.gmra.mrb[28].mxu1 %v364_v9  ;;  %v331_v16 = vmin.f32 %v306_v10, 6.0  ;;  %1165 = vmatpush3.bf16.msra.mxu0 %v1237_v54 }
  0xf5   :  { %v185_v15 = vpop.f32.mrb[12].mxu0  ;;  %1114 = vmatprep.mubr.msk.bf16.mxu1 %vm1239_vm0, %v1238_v0  ;;  %v307_v17 = vmax.f32 %v282_v11, 0.0  ;;  %v241_v21 = vpop.f32.mrb[12].mxu1 }
  0xf6   :  { %v318_v18 = vmin.f32 %v293_v14, 6.0  ;;  %v186_v19 = vadd.f32 %v185_v15, %v1461_v57  ;;  %v1052_v20 = vpop.f32.mrb[13].mxu0  ;;  %v1492_v24 = vmul.f32 %v331_v16, %v234_v58  ;;  %v242_v26 = vadd.f32 %v241_v21, %v1461_v57  ;;  %v1080_v27 = vpop.f32.mrb[13].mxu1 }
  0xf7   :  { %v188_v22 = vpop.f32.mrb[14].mxu0  ;;  %v332_v25 = vmin.f32 %v307_v17, 6.0  ;;  %v342_v28 = vmul.f32 %v317_v13, %v178_v49  ;;  %v244_v34 = vpop.f32.mrb[14].mxu1 }
  0xf8   :  { %v343_v29 = vmul.f32 %v318_v18, %v181_v63  ;;  %v269_v30 = vadd.f32 3.0, %v186_v19  ;;  %v189_v31 = vadd.f32 %v188_v22, %v1461_v57  ;;  %v1053_v32 = vpop.f32.mrb[15].mxu0  ;;  %v283_v36 = vadd.f32 3.0, %v242_v26  ;;  %v1081_v38 = vpop.f32.mrb[15].mxu1 }
  0xf9   :  { %v1496_v35 = vmul.f32 %v332_v25, %v237_v5  ;;  %v245_v37 = vadd.f32 %v244_v34, %v1461_v57 }
  0xfa   :  { %v294_v39 = vmax.f32 %v269_v30, 0.0  ;;  %v270_v40 = vadd.f32 3.0, %v189_v31  ;;  %v365_v41 = vpack.c.bf16 %v343_v29, %v342_v28  ;;  %v308_v43 = vmax.f32 %v283_v36, 0.0 }
  0xfb   :  { %v284_v44 = vadd.f32 3.0, %v245_v37  ;;  %v372_v45 = vpack.c.bf16 %v1496_v35, %v1492_v24 }
  0xfc   :  { %v319_v46 = vmin.f32 %v294_v39, 6.0  ;;  %v295_v47 = vmax.f32 %v270_v40, 0.0  ;;  %1115 = vmatmul.mubr.bf16.gmra.mrb[32].mxu1 %v365_v41  ;;  %v333_v49 = vmin.f32 %v308_v43, 6.0 }
  0xfd   :  { %v193_v48 = vpop.f32.mrb[16].mxu0  ;;  %1118 = vmatprep.mubr.msk.bf16.mxu1 %vm1239_vm0, %v1238_v0  ;;  %v309_v50 = vmax.f32 %v284_v44, 0.0  ;;  %v249_v58 = vpop.f32.mrb[16].mxu1 }
  0xfe   :  { %v320_v51 = vmin.f32 %v295_v47, 6.0  ;;  %v194_v53 = vadd.f32 %v193_v48, %v1461_v57  ;;  %v1056_v55 = vpop.f32.mrb[17].mxu0  ;;  %v1504_v60 = vmul.f32 %v333_v49, %v242_v26  ;;  %v250_v62 = vadd.f32 %v249_v58, %v1461_v57  ;;  %v1084_v63 = vpop.f32.mrb[17].mxu1 }
  0xff   :  { %v196_v59 = vpop.f32.mrb[18].mxu0  ;;  %v334_v61 = vmin.f32 %v309_v50, 6.0  ;;  %v344_v1 = vmul.f32 %v319_v46, %v186_v19  ;;  %v252_v7 = vpop.f32.mrb[18].mxu1 }
 0x100   :  { %v345_v2 = vmul.f32 %v320_v51, %v189_v31  ;;  %v271_v4 = vadd.f32 3.0, %v194_v53  ;;  %v197_v5 = vadd.f32 %v196_v59, %v1461_v57  ;;  %v1057_v6 = vpop.f32.mrb[19].mxu0  ;;  %v285_v9 = vadd.f32 3.0, %v250_v62  ;;  %v1085_v11 = vpop.f32.mrb[19].mxu1 }
 0x101   :  { %v1508_v8 = vmul.f32 %v334_v61, %v245_v37  ;;  %v253_v10 = vadd.f32 %v252_v7, %v1461_v57 }
 0x102   :  { %v296_v13 = vmax.f32 %v271_v4, 0.0  ;;  %v272_v14 = vadd.f32 3.0, %v197_v5  ;;  %v366_v15 = vpack.c.bf16 %v345_v2, %v344_v1  ;;  %v310_v16 = vmax.f32 %v285_v9, 0.0 }
 0x103   :  { %v286_v17 = vadd.f32 3.0, %v253_v10  ;;  %v373_v18 = vpack.c.bf16 %v1508_v8, %v1504_v60 }
 0x104   :  { %v321_v19 = vmin.f32 %v296_v13, 6.0  ;;  %v297_v20 = vmax.f32 %v272_v14, 0.0  ;;  %1119 = vmatmul.mubr.bf16.gmra.mrb[36].mxu1 %v366_v15  ;;  %v335_v22 = vmin.f32 %v310_v16, 6.0 }
 0x105   :  { %v201_v21 = vpop.f32.mrb[20].mxu0  ;;  %1122 = vmatprep.mubr.msk.bf16.mxu1 %vm1239_vm0, %v1238_v0  ;;  %v311_v25 = vmax.f32 %v286_v17, 0.0  ;;  %v257_v29 = vpop.f32.mrb[20].mxu1 }
 0x106   :  { %v322_v26 = vmin.f32 %v297_v20, 6.0  ;;  %v202_v27 = vadd.f32 %v201_v21, %v1461_v57  ;;  %v1060_v28 = vpop.f32.mrb[21].mxu0  ;;  %v360_v31 = vmul.f32 %v335_v22, %v250_v62  ;;  %v258_v34 = vadd.f32 %v257_v29, %v1461_v57  ;;  %v1088_v36 = vpop.f32.mrb[21].mxu1 }
 0x107   :  { %v204_v30 = vpop.f32.mrb[22].mxu0  ;;  %v336_v32 = vmin.f32 %v311_v25, 6.0  ;;  %v346_v37 = vmul.f32 %v321_v19, %v194_v53  ;;  %v260_v43 = vpop.f32.mrb[22].mxu1 }
 0x108   :  { %v347_v38 = vmul.f32 %v322_v26, %v197_v5  ;;  %v273_v39 = vadd.f32 3.0, %v202_v27  ;;  %v205_v40 = vadd.f32 %v204_v30, %v1461_v57  ;;  %v1061_v41 = vpop.f32.mrb[23].mxu0  ;;  %v1089_v46 = vpop.f32.mrb[23].mxu1 }
 0x109   :  { %v361_v44 = vmul.f32 %v336_v32, %v253_v10 }
 0x10a   :  { %v298_v47 = vmax.f32 %v273_v39, 0.0  ;;  %v274_v48 = vadd.f32 3.0, %v205_v40  ;;  %v367_v49 = vpack.c.bf16 %v347_v38, %v346_v37 }
 0x10b   :  { %v374_v50 = vpack.c.bf16 %v361_v44, %v360_v31 }
 0x10c   :  { %v323_v51 = vmin.f32 %v298_v47, 6.0  ;;  %v299_v55 = vmax.f32 %v274_v48, 0.0  ;;  %1123 = vmatmul.mubr.bf16.gmra.mrb[40].mxu1 %v367_v49 }
 0x10d   :  { %v209_v58 = vpop.f32.mrb[24].mxu0  ;;  %1126 = vmatprep.mubr.msk.bf16.mxu1 %vm1239_vm0, %v1238_v0 }
 0x10e   :  { %v324_v53 = vmin.f32 %v299_v55, 6.0  ;;  %v210_v59 = vadd.f32 %v209_v58, %v1461_v57  ;;  %v1064_v60 = vpop.f32.mrb[25].mxu0  ;;  %v348_v62 = vmul.f32 %v323_v51, %v202_v27 }
 0x10f   :  { %v212_v61 = vpop.f32.mrb[26].mxu0 }
 0x110   :  { %v349_v63 = vmul.f32 %v324_v53, %v205_v40  ;;  %v275_v1 = vadd.f32 3.0, %v210_v59  ;;  %v213_v2 = vadd.f32 %v212_v61, %v1461_v57  ;;  %v1065_v4 = vpop.f32.mrb[27].mxu0  ;;  %v287_v57 = vadd.f32 3.0, %v258_v34 }
 0x112   :  { %v300_v5 = vmax.f32 %v275_v1, 0.0  ;;  %v276_v6 = vadd.f32 3.0, %v213_v2  ;;  %v368_v7 = vpack.c.bf16 %v349_v63, %v348_v62  ;;  %v312_v23 = vmax.f32 %v287_v57, 0.0 }
 0x114   :  { %v325_v8 = vmin.f32 %v300_v5, 6.0  ;;  %v301_v9 = vmax.f32 %v276_v6, 0.0  ;;  %1127 = vmatmul.mubr.bf16.gmra.mrb[44].mxu1 %v368_v7  ;;  %v337_v33 = vmin.f32 %v312_v23, 6.0 }
 0x115   :  { %1130 = vmatprep.mubr.msk.bf16.mxu1 %vm1239_vm0, %v1238_v0 }
 0x116   :  { %v326_v10 = vmin.f32 %v301_v9, 6.0  ;;  %v350_v11 = vmul.f32 %v325_v8, %v210_v59 }
 0x118   :  { %v351_v13 = vmul.f32 %v326_v10, %v213_v2 }
 0x11a   :  { %v369_v14 = vpack.c.bf16 %v351_v13, %v350_v11 }
 0x11c   :  { %1131 = vmatmul.mubr.bf16.gmra.mrb[48].mxu1 %v369_v14 }
 0x11d   :  { %1134 = vmatprep.mubr.msk.bf16.mxu1 %vm1239_vm0, %v1238_v0 }
 0x124   :  { %1135 = vmatmul.mubr.bf16.gmra.mrb[52].mxu1 %v370_v42  ;;  %v362_v42 = vmul.f32 %v337_v33, %v258_v34 }
 0x125   :  { %1138 = vmatprep.mubr.msk.bf16.mxu1 %vm1239_vm0, %v1238_v0 }
 0x126   :  { %v375_v3 = vpack.c.bf16 %v362_v42, %v362_v42 }
 0x12c   :  { %1139 = vmatmul.mubr.bf16.gmra.mrb[56].mxu1 %v371_v12  ;;  %v392_v12 = vld [vmem:[%s1752_s4] sm:$0x1] }
 0x12d   :  { %1142 = vmatprep.mubr.msk.bf16.mxu1 %vm1239_vm0, %v1238_v0  ;;  %v393_v24 = vunpack.c.l.bf16 %v392_v12 }
 0x12f   :  { %v1553_v35 = vrot.slane %v393_v24, %v73_v56 }
 0x134   :  { %1143 = vmatmul.mubr.bf16.gmra.mrb[60].mxu1 %v372_v45 }
 0x135   :  { %1146 = vmatprep.mubr.msk.bf16.mxu1 %vm1239_vm0, %v1238_v0 }
 0x13c   :  { %1147 = vmatmul.mubr.bf16.gmra.mrb[64].mxu1 %v373_v18 }
 0x13d   :  { %1150 = vmatprep.mubr.msk.bf16.mxu1 %vm1239_vm0, %v1238_v0 }
 0x144   :  { %1151 = vmatmul.mubr.bf16.gmra.mrb[68].mxu1 %v374_v50 }
 0x145   :  { %1154 = vmatprep.mubr.msk.bf16.mxu1 %vm1239_vm0, %v1238_v0 }
 0x14c   :  { %1155 = vmatmul.mubr.bf16.gmra.mrb[72].mxu1 %v375_v3 }
 0x1bf   :  { %v480_v45 = vpop.f32.mrb[24].mxu1 }
 0x1c0   :  { %v481_v15 = vadd.f32 %v480_v45, %v1553_v35  ;;  %v1108_v16 = vpop.f32.mrb[25].mxu1 }
 0x1c1   :  { %v483_v17 = vpop.f32.mrb[26].mxu1 }
 0x1c2   :  { %v582_v18 = vadd.f32 3.0, %v481_v15  ;;  %v484_v19 = vadd.f32 %v483_v17, %v1553_v35  ;;  %v1109_v20 = vpop.f32.mrb[27].mxu1 }
 0x1c4   :  { %v607_v21 = vmax.f32 %v582_v18, 0.0  ;;  %v583_v22 = vadd.f32 3.0, %v484_v19 }
 0x1c6   :  { %v632_v25 = vmin.f32 %v607_v21, 6.0  ;;  %v608_v26 = vmax.f32 %v583_v22, 0.0 }
 0x1c7   :  { %v488_v27 = vpop.f32.mrb[28].mxu1 }
 0x1c8   :  { %v633_v28 = vmin.f32 %v608_v26, 6.0  ;;  %v489_v29 = vadd.f32 %v488_v27, %v1553_v35  ;;  %v1112_v52 = vpop.f32.mrb[29].mxu1  ;;  %v657_v30 = vmul.f32 %v632_v25, %v481_v15 }
 0x1c9   :  { %v491_v56 = vpop.f32.mrb[30].mxu1 }
 0x1ca   :  { %v658_v31 = vmul.f32 %v633_v28, %v484_v19  ;;  %v584_v32 = vadd.f32 3.0, %v489_v29  ;;  %v492_v34 = vadd.f32 %v491_v56, %v1553_v35  ;;  %v1113_v36 = vpop.f32.mrb[31].mxu1 }
 0x1cc   :  { %v682_v37 = vpack.c.bf16 %v658_v31, %v657_v30  ;;  %v609_v38 = vmax.f32 %v584_v32, 0.0  ;;  %v585_v39 = vadd.f32 3.0, %v492_v34 }
 0x1ce   :  { %v634_v40 = vmin.f32 %v609_v38, 6.0  ;;  %v610_v41 = vmax.f32 %v585_v39, 0.0  ;;  %1167 = vmatmul.mubr.msk.bf16.vlgmr.msra.gmra.mrb[28].mxu0 %vm734_vm2, %v682_v37 }
 0x1cf   :  { %v496_v43 = vpop.f32.mrb[32].mxu1  ;;  %1170 = vmatprep.mubr.msk.bf16.mxu0 %vm1239_vm0, %v1238_v0 }
 0x1d0   :  { %v635_v44 = vmin.f32 %v610_v41, 6.0  ;;  %v497_v46 = vadd.f32 %v496_v43, %v1553_v35  ;;  %v1116_v47 = vpop.f32.mrb[33].mxu1  ;;  %v659_v49 = vmul.f32 %v634_v40, %v489_v29 }
 0x1d1   :  { %v499_v48 = vpop.f32.mrb[34].mxu1 }
 0x1d2   :  { %v660_v50 = vmul.f32 %v635_v44, %v492_v34  ;;  %v586_v51 = vadd.f32 3.0, %v497_v46  ;;  %v500_v55 = vadd.f32 %v499_v48, %v1553_v35  ;;  %v1117_v58 = vpop.f32.mrb[35].mxu1 }
 0x1d4   :  { %v683_v53 = vpack.c.bf16 %v660_v50, %v659_v49  ;;  %v611_v59 = vmax.f32 %v586_v51, 0.0  ;;  %v587_v60 = vadd.f32 3.0, %v500_v55 }
 0x1d6   :  { %v636_v61 = vmin.f32 %v611_v59, 6.0  ;;  %v612_v62 = vmax.f32 %v587_v60, 0.0  ;;  %1171 = vmatmul.mubr.msk.bf16.gmra.mrb[32].mxu0 %vm734_vm2, %v683_v53 }
 0x1d7   :  { %v504_v63 = vpop.f32.mrb[36].mxu1  ;;  %1174 = vmatprep.mubr.msk.bf16.mxu0 %vm1239_vm0, %v1238_v0 }
 0x1d8   :  { %v637_v1 = vmin.f32 %v612_v62, 6.0  ;;  %v505_v2 = vadd.f32 %v504_v63, %v1553_v35  ;;  %v1120_v4 = vpop.f32.mrb[37].mxu1  ;;  %v661_v6 = vmul.f32 %v636_v61, %v497_v46 }
 0x1d9   :  { %v507_v5 = vpop.f32.mrb[38].mxu1 }
 0x1da   :  { %v662_v7 = vmul.f32 %v637_v1, %v500_v55  ;;  %v588_v8 = vadd.f32 3.0, %v505_v2  ;;  %v508_v9 = vadd.f32 %v507_v5, %v1553_v35  ;;  %v1121_v10 = vpop.f32.mrb[39].mxu1 }
 0x1dc   :  { %v684_v11 = vpack.c.bf16 %v662_v7, %v661_v6  ;;  %v613_v13 = vmax.f32 %v588_v8, 0.0  ;;  %v589_v14 = vadd.f32 3.0, %v508_v9 }
 0x1de   :  { %v638_v57 = vmin.f32 %v613_v13, 6.0  ;;  %v614_v23 = vmax.f32 %v589_v14, 0.0  ;;  %1175 = vmatmul.mubr.msk.bf16.gmra.mrb[36].mxu0 %vm734_vm2, %v684_v11 }
 0x1df   :  { %v512_v33 = vpop.f32.mrb[40].mxu1  ;;  %1178 = vmatprep.mubr.msk.bf16.mxu0 %vm1239_vm0, %v1238_v0 }
 0x1e0   :  { %v639_v42 = vmin.f32 %v614_v23, 6.0  ;;  %v513_v54 = vadd.f32 %v512_v33, %v1553_v35  ;;  %v1124_v3 = vpop.f32.mrb[41].mxu1  ;;  %v663_v24 = vmul.f32 %v638_v57, %v505_v2 }
 0x1e1   :  { %v515_v12 = vpop.f32.mrb[42].mxu1 }
 0x1e2   :  { %v664_v45 = vmul.f32 %v639_v42, %v508_v9  ;;  %v590_v15 = vadd.f32 3.0, %v513_v54  ;;  %v516_v16 = vadd.f32 %v515_v12, %v1553_v35  ;;  %v1125_v17 = vpop.f32.mrb[43].mxu1 }
 0x1e4   :  { %v685_v18 = vpack.c.bf16 %v664_v45, %v663_v24  ;;  %v615_v19 = vmax.f32 %v590_v15, 0.0  ;;  %v591_v20 = vadd.f32 3.0, %v516_v16 }
 0x1e6   :  { %v640_v21 = vmin.f32 %v615_v19, 6.0  ;;  %v616_v22 = vmax.f32 %v591_v20, 0.0  ;;  %1179 = vmatmul.mubr.msk.bf16.gmra.mrb[40].mxu0 %vm734_vm2, %v685_v18 }
 0x1e7   :  { %v520_v25 = vpop.f32.mrb[44].mxu1  ;;  %1182 = vmatprep.mubr.msk.bf16.mxu0 %vm1239_vm0, %v1238_v0 }
 0x1e8   :  { %v641_v26 = vmin.f32 %v616_v22, 6.0  ;;  %v521_v27 = vadd.f32 %v520_v25, %v1553_v35  ;;  %v1128_v28 = vpop.f32.mrb[45].mxu1  ;;  %v665_v52 = vmul.f32 %v640_v21, %v513_v54 }
 0x1e9   :  { %v523_v29 = vpop.f32.mrb[46].mxu1 }
 0x1ea   :  { %v666_v56 = vmul.f32 %v641_v26, %v516_v16  ;;  %v592_v30 = vadd.f32 3.0, %v521_v27  ;;  %v524_v31 = vadd.f32 %v523_v29, %v1553_v35  ;;  %v1129_v32 = vpop.f32.mrb[47].mxu1 }
 0x1ec   :  { %v686_v34 = vpack.c.bf16 %v666_v56, %v665_v52  ;;  %v617_v36 = vmax.f32 %v592_v30, 0.0  ;;  %v593_v37 = vadd.f32 3.0, %v524_v31 }
 0x1ee   :  { %v642_v38 = vmin.f32 %v617_v36, 6.0  ;;  %v618_v39 = vmax.f32 %v593_v37, 0.0  ;;  %1183 = vmatmul.mubr.msk.bf16.gmra.mrb[44].mxu0 %vm734_vm2, %v686_v34 }
 0x1ef   :  { %v528_v40 = vpop.f32.mrb[48].mxu1  ;;  %1186 = vmatprep.mubr.msk.bf16.mxu0 %vm1239_vm0, %v1238_v0 }
 0x1f0   :  { %v643_v41 = vmin.f32 %v618_v39, 6.0  ;;  %v529_v43 = vadd.f32 %v528_v40, %v1553_v35  ;;  %v1132_v44 = vpop.f32.mrb[49].mxu1  ;;  %v667_v47 = vmul.f32 %v642_v38, %v521_v27 }
 0x1f1   :  { %v531_v46 = vpop.f32.mrb[50].mxu1 }
 0x1f2   :  { %v668_v48 = vmul.f32 %v643_v41, %v524_v31  ;;  %v594_v49 = vadd.f32 3.0, %v529_v43  ;;  %v532_v50 = vadd.f32 %v531_v46, %v1553_v35  ;;  %v1133_v51 = vpop.f32.mrb[51].mxu1 }
 0x1f4   :  { %v687_v55 = vpack.c.bf16 %v668_v48, %v667_v47  ;;  %v619_v58 = vmax.f32 %v594_v49, 0.0  ;;  %v595_v53 = vadd.f32 3.0, %v532_v50 }
 0x1f6   :  { %v644_v59 = vmin.f32 %v619_v58, 6.0  ;;  %v620_v60 = vmax.f32 %v595_v53, 0.0  ;;  %1187 = vmatmul.mubr.msk.bf16.gmra.mrb[48].mxu0 %vm734_vm2, %v687_v55 }
 0x1f7   :  { %v536_v61 = vpop.f32.mrb[52].mxu1  ;;  %1190 = vmatprep.mubr.msk.bf16.mxu0 %vm1239_vm0, %v1238_v0 }
 0x1f8   :  { %v645_v62 = vmin.f32 %v620_v60, 6.0  ;;  %v537_v63 = vadd.f32 %v536_v61, %v1553_v35  ;;  %v1136_v1 = vpop.f32.mrb[53].mxu1  ;;  %v669_v4 = vmul.f32 %v644_v59, %v529_v43 }
 0x1f9   :  { %v539_v2 = vpop.f32.mrb[54].mxu1 }
 0x1fa   :  { %v670_v5 = vmul.f32 %v645_v62, %v532_v50  ;;  %v596_v6 = vadd.f32 3.0, %v537_v63  ;;  %v540_v7 = vadd.f32 %v539_v2, %v1553_v35  ;;  %v1137_v8 = vpop.f32.mrb[55].mxu1 }
 0x1fc   :  { %v688_v9 = vpack.c.bf16 %v670_v5, %v669_v4  ;;  %v621_v10 = vmax.f32 %v596_v6, 0.0  ;;  %v597_v11 = vadd.f32 3.0, %v540_v7 }
 0x1fe   :  { %v646_v13 = vmin.f32 %v621_v10, 6.0  ;;  %v622_v14 = vmax.f32 %v597_v11, 0.0  ;;  %1191 = vmatmul.mubr.msk.bf16.gmra.mrb[52].mxu0 %vm734_vm2, %v688_v9 }
 0x1ff   :  { %v544_v57 = vpop.f32.mrb[56].mxu1  ;;  %1194 = vmatprep.mubr.msk.bf16.mxu0 %vm1239_vm0, %v1238_v0 }
 0x200   :  { %v647_v23 = vmin.f32 %v622_v14, 6.0  ;;  %v545_v33 = vadd.f32 %v544_v57, %v1553_v35  ;;  %v1140_v42 = vpop.f32.mrb[57].mxu1  ;;  %v671_v3 = vmul.f32 %v646_v13, %v537_v63 }
 0x201   :  { %v547_v54 = vpop.f32.mrb[58].mxu1 }
 0x202   :  { %v672_v12 = vmul.f32 %v647_v23, %v540_v7  ;;  %v598_v24 = vadd.f32 3.0, %v545_v33  ;;  %v548_v45 = vadd.f32 %v547_v54, %v1553_v35  ;;  %v1141_v15 = vpop.f32.mrb[59].mxu1 }
 0x204   :  { %v689_v16 = vpack.c.bf16 %v672_v12, %v671_v3  ;;  %v623_v17 = vmax.f32 %v598_v24, 0.0  ;;  %v599_v18 = vadd.f32 3.0, %v548_v45 }
 0x206   :  { %v648_v19 = vmin.f32 %v623_v17, 6.0  ;;  %v624_v20 = vmax.f32 %v599_v18, 0.0  ;;  %1195 = vmatmul.mubr.msk.bf16.gmra.mrb[56].mxu0 %vm734_vm2, %v689_v16 }
 0x207   :  { %v552_v21 = vpop.f32.mrb[60].mxu1  ;;  %1198 = vmatprep.mubr.msk.bf16.mxu0 %vm1239_vm0, %v1238_v0 }
 0x208   :  { %v649_v22 = vmin.f32 %v624_v20, 6.0  ;;  %v553_v25 = vadd.f32 %v552_v21, %v1553_v35  ;;  %v1144_v26 = vpop.f32.mrb[61].mxu1  ;;  %v673_v28 = vmul.f32 %v648_v19, %v545_v33 }
 0x209   :  { %v555_v27 = vpop.f32.mrb[62].mxu1 }
 0x20a   :  { %v674_v29 = vmul.f32 %v649_v22, %v548_v45  ;;  %v600_v52 = vadd.f32 3.0, %v553_v25  ;;  %v556_v56 = vadd.f32 %v555_v27, %v1553_v35  ;;  %v1145_v30 = vpop.f32.mrb[63].mxu1 }
 0x20c   :  { %v690_v31 = vpack.c.bf16 %v674_v29, %v673_v28  ;;  %v625_v32 = vmax.f32 %v600_v52, 0.0  ;;  %v601_v34 = vadd.f32 3.0, %v556_v56 }
 0x20e   :  { %v650_v36 = vmin.f32 %v625_v32, 6.0  ;;  %v626_v37 = vmax.f32 %v601_v34, 0.0  ;;  %1199 = vmatmul.mubr.msk.bf16.gmra.mrb[60].mxu0 %vm734_vm2, %v690_v31 }
 0x20f   :  { %v560_v38 = vpop.f32.mrb[64].mxu1  ;;  %1202 = vmatprep.mubr.msk.bf16.mxu0 %vm1239_vm0, %v1238_v0 }
 0x210   :  { %v651_v39 = vmin.f32 %v626_v37, 6.0  ;;  %v561_v40 = vadd.f32 %v560_v38, %v1553_v35  ;;  %v1148_v41 = vpop.f32.mrb[65].mxu1  ;;  %v675_v44 = vmul.f32 %v650_v36, %v553_v25 }
 0x211   :  { %v563_v43 = vpop.f32.mrb[66].mxu1 }
 0x212   :  { %v676_v46 = vmul.f32 %v651_v39, %v556_v56  ;;  %v602_v47 = vadd.f32 3.0, %v561_v40  ;;  %v564_v48 = vadd.f32 %v563_v43, %v1553_v35  ;;  %v1149_v49 = vpop.f32.mrb[67].mxu1 }
 0x214   :  { %v691_v50 = vpack.c.bf16 %v676_v46, %v675_v44  ;;  %v627_v51 = vmax.f32 %v602_v47, 0.0  ;;  %v603_v55 = vadd.f32 3.0, %v564_v48 }
 0x216   :  { %v652_v58 = vmin.f32 %v627_v51, 6.0  ;;  %v628_v53 = vmax.f32 %v603_v55, 0.0  ;;  %1203 = vmatmul.mubr.msk.bf16.gmra.mrb[64].mxu0 %vm734_vm2, %v691_v50 }
 0x217   :  { %v568_v59 = vpop.f32.mrb[68].mxu1  ;;  %1206 = vmatprep.mubr.msk.bf16.mxu0 %vm1239_vm0, %v1238_v0 }
 0x218   :  { %v653_v60 = vmin.f32 %v628_v53, 6.0  ;;  %v569_v61 = vadd.f32 %v568_v59, %v1553_v35  ;;  %v1152_v62 = vpop.f32.mrb[69].mxu1  ;;  %v677_v1 = vmul.f32 %v652_v58, %v561_v40 }
 0x219   :  { %v571_v63 = vpop.f32.mrb[70].mxu1 }
 0x21a   :  { %v678_v2 = vmul.f32 %v653_v60, %v564_v48  ;;  %v604_v4 = vadd.f32 3.0, %v569_v61  ;;  %v572_v5 = vadd.f32 %v571_v63, %v1553_v35  ;;  %v1153_v6 = vpop.f32.mrb[71].mxu1 }
 0x21c   :  { %v692_v7 = vpack.c.bf16 %v678_v2, %v677_v1  ;;  %v629_v8 = vmax.f32 %v604_v4, 0.0  ;;  %v605_v9 = vadd.f32 3.0, %v572_v5 }
 0x21e   :  { %v654_v10 = vmin.f32 %v629_v8, 6.0  ;;  %v630_v11 = vmax.f32 %v605_v9, 0.0  ;;  %1207 = vmatmul.mubr.msk.bf16.gmra.mrb[68].mxu0 %vm734_vm2, %v692_v7 }
 0x21f   :  { %v576_v13 = vpop.f32.mrb[72].mxu1  ;;  %1210 = vmatprep.mubr.msk.bf16.mxu0 %vm1239_vm0, %v1238_v0 }
 0x220   :  { %v655_v14 = vmin.f32 %v630_v11, 6.0  ;;  %v577_v57 = vadd.f32 %v576_v13, %v1553_v35  ;;  %v1156_v23 = vpop.f32.mrb[73].mxu1  ;;  %v679_v42 = vmul.f32 %v654_v10, %v569_v61  ;;  %v1620_v35 = vld [vmem:[%s1753_s6] ss:$0 sm:$0xff] }
 0x221   :  { %v579_v33 = vpop.f32.mrb[74].mxu1 }
 0x222   :  { %v680_v54 = vmul.f32 %v655_v14, %v572_v5  ;;  %v606_v3 = vadd.f32 3.0, %v577_v57  ;;  %v1157_v12 = vpop.f32.mrb[75].mxu1 }
 0x224   :  { %v693_v24 = vpack.c.bf16 %v680_v54, %v679_v42  ;;  %v631_v45 = vmax.f32 %v606_v3, 0.0 }
 0x226   :  { %v656_v15 = vmin.f32 %v631_v45, 6.0  ;;  %1211 = vmatmul.mubr.msk.bf16.gmra.mrb[72].mxu0 %vm734_vm2, %v693_v24 }
 0x227   :  { %1214 = vmatprep.mubr.msk.bf16.mxu0 %vm1239_vm0, %v1238_v0 }
 0x228   :  { %v681_v16 = vmul.f32 %v656_v15, %v577_v57 }
 0x22a   :  { %v694_v17 = vpack.c.bf16 %v681_v16, %v681_v16 }
 0x22e   :  { %1215 = vmatmul.mubr.msk.bf16.gmra.mrb[76].mxu0 %vm734_vm2, %v694_v17 }
 0x2a1   :  { %v808_v18 = vpop.f32.mrb[28].mxu0 }
 0x2a2   :  { %v809_v19 = vadd.f32 %v1620_v35, %v808_v18  ;;  %v1168_v20 = vpop.f32.mrb[29].mxu0 }
 0x2a3   :  { %v811_v21 = vpop.f32.mrb[30].mxu0 }
 0x2a4   :  { %911 = vst.msk [vmem:[%s1754_s7] sm:$0xff] %vm910_vm3, %v809_v19  ;;  %v812_v0 = vadd.f32 %v1620_v35, %v811_v21  ;;  %v1169_v22 = vpop.f32.mrb[31].mxu0 }
 0x2a6   :  { %912 = vst.msk [vmem:[%s1754_s7 + $0x8] sm:$0xff] %vm910_vm3, %v812_v0 }
 0x2a9   :  { %v816_v25 = vpop.f32.mrb[32].mxu0 }
 0x2aa   :  { %v817_v26 = vadd.f32 %v1620_v35, %v816_v25  ;;  %v1172_v27 = vpop.f32.mrb[33].mxu0 }
 0x2ab   :  { %v819_v28 = vpop.f32.mrb[34].mxu0 }
 0x2ac   :  { %913 = vst.msk [vmem:[%s1754_s7 + $0x10] sm:$0xff] %vm910_vm3, %v817_v26  ;;  %v820_v29 = vadd.f32 %v1620_v35, %v819_v28  ;;  %v1173_v52 = vpop.f32.mrb[35].mxu0 }
 0x2ae   :  { %914 = vst.msk [vmem:[%s1754_s7 + $0x18] sm:$0xff] %vm910_vm3, %v820_v29 }
 0x2b1   :  { %v824_v56 = vpop.f32.mrb[36].mxu0 }
 0x2b2   :  { %v825_v30 = vadd.f32 %v1620_v35, %v824_v56  ;;  %v1176_v31 = vpop.f32.mrb[37].mxu0 }
 0x2b3   :  { %v827_v32 = vpop.f32.mrb[38].mxu0 }
 0x2b4   :  { %915 = vst.msk [vmem:[%s1754_s7 + $0x20] sm:$0xff] %vm910_vm3, %v825_v30  ;;  %v828_v34 = vadd.f32 %v1620_v35, %v827_v32  ;;  %v1177_v36 = vpop.f32.mrb[39].mxu0 }
 0x2b6   :  { %916 = vst.msk [vmem:[%s1754_s7 + $0x28] sm:$0xff] %vm910_vm3, %v828_v34 }
 0x2b9   :  { %v832_v37 = vpop.f32.mrb[40].mxu0 }
 0x2ba   :  { %v833_v38 = vadd.f32 %v1620_v35, %v832_v37  ;;  %v1180_v39 = vpop.f32.mrb[41].mxu0 }
 0x2bb   :  { %v835_v40 = vpop.f32.mrb[42].mxu0 }
 0x2bc   :  { %917 = vst.msk [vmem:[%s1754_s7 + $0x30] sm:$0xff] %vm910_vm3, %v833_v38  ;;  %v836_v41 = vadd.f32 %v1620_v35, %v835_v40  ;;  %v1181_v43 = vpop.f32.mrb[43].mxu0 }
 0x2be   :  { %918 = vst.msk [vmem:[%s1754_s7 + $0x38] sm:$0xff] %vm910_vm3, %v836_v41 }
 0x2c1   :  { %v840_v44 = vpop.f32.mrb[44].mxu0 }
 0x2c2   :  { %v841_v46 = vadd.f32 %v1620_v35, %v840_v44  ;;  %v1184_v47 = vpop.f32.mrb[45].mxu0 }
 0x2c3   :  { %v843_v48 = vpop.f32.mrb[46].mxu0 }
 0x2c4   :  { %919 = vst.msk [vmem:[%s1754_s7 + $0x40] sm:$0xff] %vm910_vm3, %v841_v46  ;;  %v844_v49 = vadd.f32 %v1620_v35, %v843_v48  ;;  %v1185_v50 = vpop.f32.mrb[47].mxu0 }
 0x2c6   :  { %920 = vst.msk [vmem:[%s1754_s7 + $0x48] sm:$0xff] %vm910_vm3, %v844_v49 }
 0x2c9   :  { %v848_v51 = vpop.f32.mrb[48].mxu0 }
 0x2ca   :  { %v849_v55 = vadd.f32 %v1620_v35, %v848_v51  ;;  %v1188_v58 = vpop.f32.mrb[49].mxu0 }
 0x2cb   :  { %v851_v53 = vpop.f32.mrb[50].mxu0 }
 0x2cc   :  { %921 = vst.msk [vmem:[%s1754_s7 + $0x50] sm:$0xff] %vm910_vm3, %v849_v55  ;;  %v852_v59 = vadd.f32 %v1620_v35, %v851_v53  ;;  %v1189_v60 = vpop.f32.mrb[51].mxu0 }
 0x2ce   :  { %922 = vst.msk [vmem:[%s1754_s7 + $0x58] sm:$0xff] %vm910_vm3, %v852_v59 }
 0x2d1   :  { %v856_v61 = vpop.f32.mrb[52].mxu0 }
 0x2d2   :  { %v857_v62 = vadd.f32 %v1620_v35, %v856_v61  ;;  %v1192_v63 = vpop.f32.mrb[53].mxu0 }
 0x2d3   :  { %v859_v1 = vpop.f32.mrb[54].mxu0 }
 0x2d4   :  { %923 = vst.msk [vmem:[%s1754_s7 + $0x60] sm:$0xff] %vm910_vm3, %v857_v62  ;;  %v860_v2 = vadd.f32 %v1620_v35, %v859_v1  ;;  %v1193_v4 = vpop.f32.mrb[55].mxu0 }
 0x2d6   :  { %924 = vst.msk [vmem:[%s1754_s7 + $0x68] sm:$0xff] %vm910_vm3, %v860_v2 }
 0x2d9   :  { %v864_v5 = vpop.f32.mrb[56].mxu0 }
 0x2da   :  { %v865_v6 = vadd.f32 %v1620_v35, %v864_v5  ;;  %v1196_v7 = vpop.f32.mrb[57].mxu0 }
 0x2db   :  { %v867_v8 = vpop.f32.mrb[58].mxu0 }
 0x2dc   :  { %925 = vst.msk [vmem:[%s1754_s7 + $0x70] sm:$0xff] %vm910_vm3, %v865_v6  ;;  %v868_v9 = vadd.f32 %v1620_v35, %v867_v8  ;;  %v1197_v10 = vpop.f32.mrb[59].mxu0 }
 0x2de   :  { %926 = vst.msk [vmem:[%s1754_s7 + $0x78] sm:$0xff] %vm910_vm3, %v868_v9 }
 0x2e1   :  { %v872_v11 = vpop.f32.mrb[60].mxu0 }
 0x2e2   :  { %v873_v13 = vadd.f32 %v1620_v35, %v872_v11  ;;  %v1200_v14 = vpop.f32.mrb[61].mxu0 }
 0x2e3   :  { %v875_v57 = vpop.f32.mrb[62].mxu0 }
 0x2e4   :  { %927 = vst.msk [vmem:[%s1754_s7 + $0x80] sm:$0xff] %vm910_vm3, %v873_v13  ;;  %v876_v23 = vadd.f32 %v1620_v35, %v875_v57  ;;  %v1201_v33 = vpop.f32.mrb[63].mxu0 }
 0x2e6   :  { %928 = vst.msk [vmem:[%s1754_s7 + $0x88] sm:$0xff] %vm910_vm3, %v876_v23 }
 0x2e9   :  { %v880_v42 = vpop.f32.mrb[64].mxu0 }
 0x2ea   :  { %v881_v54 = vadd.f32 %v1620_v35, %v880_v42  ;;  %v1204_v3 = vpop.f32.mrb[65].mxu0 }
 0x2eb   :  { %v883_v12 = vpop.f32.mrb[66].mxu0 }
 0x2ec   :  { %929 = vst.msk [vmem:[%s1754_s7 + $0x90] sm:$0xff] %vm910_vm3, %v881_v54  ;;  %v884_v24 = vadd.f32 %v1620_v35, %v883_v12  ;;  %v1205_v45 = vpop.f32.mrb[67].mxu0 }
 0x2ee   :  { %930 = vst.msk [vmem:[%s1754_s7 + $0x98] sm:$0xff] %vm910_vm3, %v884_v24 }
 0x2f1   :  { %v888_v15 = vpop.f32.mrb[68].mxu0 }
 0x2f2   :  { %v889_v16 = vadd.f32 %v1620_v35, %v888_v15  ;;  %v1208_v17 = vpop.f32.mrb[69].mxu0 }
 0x2f3   :  { %v891_v18 = vpop.f32.mrb[70].mxu0 }
 0x2f4   :  { %931 = vst.msk [vmem:[%s1754_s7 + $0xa0] sm:$0xff] %vm910_vm3, %v889_v16  ;;  %v892_v19 = vadd.f32 %v1620_v35, %v891_v18  ;;  %v1209_v20 = vpop.f32.mrb[71].mxu0 }
 0x2f6   :  { %932 = vst.msk [vmem:[%s1754_s7 + $0xa8] sm:$0xff] %vm910_vm3, %v892_v19 }
 0x2f9   :  { %v896_v21 = vpop.f32.mrb[72].mxu0 }
 0x2fa   :  { %v897_v0 = vadd.f32 %v1620_v35, %v896_v21  ;;  %v1212_v22 = vpop.f32.mrb[73].mxu0 }
 0x2fb   :  { %v899_v25 = vpop.f32.mrb[74].mxu0 }
 0x2fc   :  { %933 = vst.msk [vmem:[%s1754_s7 + $0xb0] sm:$0xff] %vm910_vm3, %v897_v0  ;;  %v900_v26 = vadd.f32 %v1620_v35, %v899_v25  ;;  %v1213_v27 = vpop.f32.mrb[75].mxu0 }
 0x2fe   :  { %934 = vst.msk [vmem:[%s1754_s7 + $0xb8] sm:$0xff] %vm910_vm3, %v900_v26 }
 0x301   :  { %v904_v28 = vpop.f32.mrb[76].mxu0 }
 0x302   :  { %v905_v29 = vadd.f32 %v1620_v35, %v904_v28  ;;  %v1216_v52 = vpop.f32.mrb[77].mxu0 }
 0x303   :  { %v907_v56 = vpop.f32.mrb[78].mxu0 }
 0x304   :  { %935 = vst.msk [vmem:[%s1754_s7 + $0xc0] sm:$0xff] %vm910_vm3, %v905_v29  ;;  %v1217_v30 = vpop.f32.mrb[79].mxu0 }

</bundles_post_ra>
